<compile_context>
chip_gen: v7x
topology: tpu7x:2x2x1
jax: 0.10.0
libtpu: 0.0.40
codegen_flags: <defaults>
</compile_context>

<pallas_src>
import functools

import jax
import jax.numpy as jnp
from jax.experimental import pallas as pl
from jax.experimental.pallas import tpu as pltpu


FEATURE_DIM = 2048                       # ResNet-50 penultimate feature width
LANE = 128                               # TPU lane width
SUBLANE = 8                              # f32 sublane tile
K_ALIGN = 256                            # base alignment of the fused-weight K axis
DEFAULT_TILE_K = 4096                    # streamed K tile (non-resident path)
RESIDENT_WEIGHT_BYTES = 8 * 1024 * 1024  # keep fused weight fully VMEM-resident below this
MAX_TILE_B = 128                         # batch tile rows


def _cdiv(a, b):
    return -(-a // b)


def _round_up(a, b):
    return _cdiv(a, b) * b


def _pick_tile_k(k_pad, max_tile):
    """Largest multiple of K_ALIGN that divides k_pad and is <= max_tile."""
    best = K_ALIGN
    t = K_ALIGN
    while t <= min(max_tile, k_pad):
        if k_pad % t == 0:
            best = t
        t += K_ALIGN
    return best


def _bce_partial(logits, targets, i, *, batch, num_classes, tile_b):
    """Masked per-element BCEWithLogits, reduced to a lane-dense [tile_b, 128] partial."""
    per = (jnp.maximum(logits, 0.0) - logits * targets
           + jnp.log1p(jnp.exp(-jnp.abs(logits))))        # stable; exp(-|x|) <= 1
    row = jax.lax.broadcasted_iota(jnp.int32, per.shape, 0) + i * tile_b
    col = jax.lax.broadcasted_iota(jnp.int32, per.shape, 1)
    per = jnp.where((row < batch) & (col < num_classes), per, 0.0)
    nc_pad = per.shape[1]
    if nc_pad == LANE:
        return per
    # Fold class groups of 128 lanes together -> output last dim stays 128 (unmasked vst).
    return per.reshape(tile_b, nc_pad // LANE, LANE).sum(axis=1)


def _swav_resident_kernel(img_ref, w_ref, b_ref, tgt_ref, logits_ref, bce_ref,
                          *, batch, num_classes, tile_b):
    """Fused weight fully VMEM-resident: one grid step per batch tile."""
    i = pl.program_id(0)
    logits = jnp.dot(img_ref[...], w_ref[...],
                     preferred_element_type=jnp.float32) + b_ref[...]
    logits_ref[...] = logits
    bce_ref[...] = _bce_partial(logits, tgt_ref[...], i, batch=batch,
                                num_classes=num_classes, tile_b=tile_b)


def _swav_ktiled_kernel(img_ref, w_ref, b_ref, tgt_ref, logits_ref, bce_ref,
                        *, batch, num_classes, tile_b):
    """Streamed-weight path: accumulate directly into the f32 logits output."""
    i = pl.program_id(0)          # batch tile       ("parallel")
    k = pl.program_id(1)          # K reduction tile ("arbitrary", innermost)

    @pl.when(k == 0)
    def _():
        logits_ref[...] = jnp.zeros_like(logits_ref)

    # logits block index is constant across k -> it stays resident in VMEM.
    logits_ref[...] += jnp.dot(img_ref[...], w_ref[...],
                               preferred_element_type=jnp.float32)

    @pl.when(k == pl.num_programs(1) - 1)
    def _():
        logits = logits_ref[...] + b_ref[...]          # f32 epilogue
        logits_ref[...] = logits
        bce_ref[...] = _bce_partial(logits, tgt_ref[...], i, batch=batch,
                                    num_classes=num_classes, tile_b=tile_b)


def _vmem_limit_bytes(tile_b, tile_k, nc_pad):
    """Derived scoped-VMEM request with double-buffering headroom, capped for v7x."""
    per_buf = (tile_b * tile_k * 2          # image tile (bf16)
               + tile_k * nc_pad * 2        # fused weight tile (bf16)
               + nc_pad * 4                 # bias
               + tile_b * nc_pad * 4        # targets
               + tile_b * nc_pad * 4        # logits out
               + tile_b * LANE * 4)         # bce partial out
    need = 2 * per_buf                      # double-buffered pipeline
    return int(min(64 * 1024 * 1024, max(2 * need, 32 * 1024 * 1024)))


def swav_forward(image, targets, params, *, num_classes,
                 max_tile_k=DEFAULT_TILE_K, max_tile_b=MAX_TILE_B):
    """image: [B, C, H, W] f32, targets: [B, num_classes] f32 -> (logits, loss)."""
    w_fused = params["w_fused"]          # [K_pad, NC_pad]  bf16
    b_fused = params["b_fused"]          # [1, NC_pad]      f32
    k_pad, nc_pad = w_fused.shape

    batch = image.shape[0]
    tile_b = min(max_tile_b, _round_up(batch, SUBLANE))
    b_pad = _round_up(batch, tile_b)
    n_btiles = b_pad // tile_b

    img = image.reshape(batch, -1).astype(jnp.bfloat16)
    k_in = img.shape[1]
    img_p = jnp.zeros((b_pad, k_pad), jnp.bfloat16).at[:batch, :k_in].set(img)

    tgt = targets.reshape(batch, -1).astype(jnp.float32)
    tgt_p = jnp.zeros((b_pad, nc_pad), jnp.float32).at[:batch, :num_classes].set(tgt)

    weight_bytes = k_pad * nc_pad * 2
    resident = weight_bytes <= RESIDENT_WEIGHT_BYTES

    out_shape = (jax.ShapeDtypeStruct((b_pad, nc_pad), jnp.float32),  # padded logits
                 jax.ShapeDtypeStruct((b_pad, LANE), jnp.float32))    # BCE partials

    if resident:
        tile_k = k_pad
        weight_streams = 1                 # constant index_map -> fetched once
        kernel = functools.partial(_swav_resident_kernel, batch=batch,
                                   num_classes=num_classes, tile_b=tile_b)
        grid = (n_btiles,)
        in_specs = [
            pl.BlockSpec((tile_b, k_pad), lambda i: (i, 0)),    # image batch tile
            pl.BlockSpec((k_pad, nc_pad), lambda i: (0, 0)),    # resident fused weight
            pl.BlockSpec((1, nc_pad), lambda i: (0, 0)),        # fused bias
            pl.BlockSpec((tile_b, nc_pad), lambda i: (i, 0)),   # targets
        ]
        out_specs = (
            pl.BlockSpec((tile_b, nc_pad), lambda i: (i, 0)),   # logits
            pl.BlockSpec((tile_b, LANE), lambda i: (i, 0)),     # BCE partial
        )
        semantics = ("parallel",)
    else:
        tile_k = _pick_tile_k(k_pad, max_tile_k)
        weight_streams = n_btiles          # weight re-streamed once per batch tile
        kernel = functools.partial(_swav_ktiled_kernel, batch=batch,
                                   num_classes=num_classes, tile_b=tile_b)
        grid = (n_btiles, k_pad // tile_k)
        in_specs = [
            pl.BlockSpec((tile_b, tile_k), lambda i, k: (i, k)),   # image K tile
            pl.BlockSpec((tile_k, nc_pad), lambda i, k: (k, 0)),   # streamed fused weight
            pl.BlockSpec((1, nc_pad), lambda i, k: (0, 0)),        # fused bias
            pl.BlockSpec((tile_b, nc_pad), lambda i, k: (i, 0)),   # targets
        ]
        out_specs = (
            pl.BlockSpec((tile_b, nc_pad), lambda i, k: (i, 0)),   # logits (accumulator)
            pl.BlockSpec((tile_b, LANE), lambda i, k: (i, 0)),     # BCE partial
        )
        semantics = ("parallel", "arbitrary")

    grid_spec = pltpu.PrefetchScalarGridSpec(
        num_scalar_prefetch=0,
        grid=grid,
        in_specs=in_specs,
        out_specs=out_specs,
    )

    flops = 2 * b_pad * k_pad * nc_pad
    bytes_accessed = (b_pad * k_pad * 2                      # image (bf16)
                      + weight_streams * weight_bytes        # fused weight stream(s)
                      + nc_pad * 4                           # bias
                      + b_pad * nc_pad * 4                   # targets
                      + b_pad * nc_pad * 4                   # logits writeback
                      + b_pad * LANE * 4)                    # BCE partial writeback
    cost = pl.CostEstimate(flops=flops,
                           transcendentals=2 * b_pad * nc_pad,
                           bytes_accessed=bytes_accessed)

    logits_p, bce_p = pl.pallas_call(
        kernel,
        grid_spec=grid_spec,
        out_shape=out_shape,
        compiler_params=pltpu.CompilerParams(
            dimension_semantics=semantics,
            vmem_limit_bytes=_vmem_limit_bytes(tile_b, tile_k, nc_pad)),
        cost_estimate=cost,
    )(img_p, w_fused, b_fused, tgt_p)

    logits = logits_p[:batch, :num_classes]
    loss = jnp.sum(bce_p) / (batch * num_classes)   # mean over real (B x NC) entries
    return logits, loss


def init_params(key, chw, num_classes):
    """Deterministic synthetic parameters, folded + padded for the kernel.

    TODO(synk): real SwAV ResNet-50 conv weights are unavailable in-script; the
    backbone is a frozen affine stand-in over the flattened image.
    """
    f32 = jnp.float32
    ks = jax.random.split(key, 4)

    # Backbone stand-in producing the [B, 2048] feature interface.
    w_bb = jax.random.normal(ks[0], (chw, FEATURE_DIM), f32) / jnp.sqrt(1.0 * chw)
    b_bb = 0.01 * jax.random.normal(ks[1], (1, FEATURE_DIM), f32)

    # Replaced head: nn.Linear(2048, num_classes).
    w_fc = jax.random.normal(ks[2], (FEATURE_DIM, num_classes), f32) / jnp.sqrt(1.0 * FEATURE_DIM)
    b_fc = 0.01 * jax.random.normal(ks[3], (1, num_classes), f32)

    # Lane-pad the class dim (128, or 256-aligned past 128 for v6e/v7x 256x256 MXUs).
    nc_align = LANE if num_classes <= LANE else 2 * LANE
    nc_pad = _round_up(num_classes, nc_align)
    w_fc_p = jnp.zeros((FEATURE_DIM, nc_pad), f32).at[:, :num_classes].set(w_fc)
    b_fc_p = jnp.zeros((1, nc_pad), f32).at[:, :num_classes].set(b_fc)

    # Fold the two frozen affine maps:
    #   logits = img @ (w_bb @ w_fc) + (b_bb @ w_fc + b_fc)
    w_fused = w_bb @ w_fc_p                     # [CHW, nc_pad]
    b_fused = b_bb @ w_fc_p + b_fc_p            # [1,   nc_pad]

    # Pad K to the base alignment; cast weights to bf16 (f32 accumulate in-kernel).
    k_pad = _round_up(chw, K_ALIGN)
    w_fused_p = (jnp.zeros((k_pad, nc_pad), f32).at[:chw].set(w_fused)
                 ).astype(jnp.bfloat16)

    return dict(w_fused=w_fused_p, b_fused=b_fused)


if __name__ == "__main__":
    B, C, H, W = 2, 4, 16, 16
    NUM_CLASSES = 4                       # multi-label head -> BCEWithLogitsLoss targets

    key = jax.random.PRNGKey(0)
    k_img, k_tgt, k_par = jax.random.split(key, 3)
    image = jax.random.normal(k_img, (B, C, H, W), jnp.float32)
    targets = jax.random.bernoulli(k_tgt, 0.5, (B, NUM_CLASSES)).astype(jnp.float32)
    params = init_params(k_par, C * H * W, NUM_CLASSES)

    fwd = jax.jit(functools.partial(swav_forward, num_classes=NUM_CLASSES))
    logits, loss = fwd(image, targets, params)
    jax.block_until_ready((logits, loss))

    # Pure-JAX reference with identical bf16 operand rounding (loose tolerance:
    # only accumulation order differs).
    chw = C * H * W
    img_bf = image.reshape(B, -1).astype(jnp.bfloat16).astype(jnp.float32)
    w_ref = params["w_fused"].astype(jnp.float32)[:chw, :NUM_CLASSES]
    ref_logits = img_bf @ w_ref + params["b_fused"][:, :NUM_CLASSES]
    ref_loss = jnp.mean(jnp.maximum(ref_logits, 0.0) - ref_logits * targets
                        + jnp.log1p(jnp.exp(-jnp.abs(ref_logits))))

    assert logits.shape == (B, NUM_CLASSES)
    assert loss.shape == ()
    assert bool(jnp.isfinite(loss))
    assert bool(jnp.allclose(logits, ref_logits, rtol=1e-2, atol=1e-2))
    assert bool(jnp.allclose(loss, ref_loss, rtol=1e-2, atol=1e-2))
    print("KERNEL_OK")
</pallas_src>

<mosaic_0001>
module attributes {stable_mosaic.version = 11 : i64} {
  func.func @_swav_resident_kernel(%arg0: i32, %arg1: memref<8x1024xbf16, #tpu.memory_space<vmem>>, %arg2: memref<1024x128xbf16, #tpu.memory_space<vmem>>, %arg3: memref<1x128xf32, #tpu.memory_space<vmem>>, %arg4: memref<8x128xf32, #tpu.memory_space<vmem>>, %arg5: memref<8x128xf32, #tpu.memory_space<vmem>>, %arg6: memref<8x128xf32, #tpu.memory_space<vmem>>) attributes {dimension_semantics = [#tpu.dimension_semantics<parallel>], iteration_bounds = array<i64: 1>, scalar_prefetch = 0 : i64, scratch_operands = 0 : i64, tpu.core_type = #tpu.core_type<tc>, window_params = [{transform_indices = @transform_0, window_bounds = array<i64: 8, 1024>}, {pipeline_mode = #tpu.pipeline_mode<synchronous>, transform_indices = @transform_1, window_bounds = array<i64: 1024, 128>}, {pipeline_mode = #tpu.pipeline_mode<synchronous>, transform_indices = @transform_2, window_bounds = array<i64: 1, 128>}, {transform_indices = @transform_3, window_bounds = array<i64: 8, 128>}, {transform_indices = @transform_4, window_bounds = array<i64: 8, 128>}, {transform_indices = @transform_5, window_bounds = array<i64: 8, 128>}]} {
    %c0 = arith.constant 0 : index
    %c0_0 = arith.constant 0 : index
    %0 = vector.load %arg1[%c0, %c0_0] : memref<8x1024xbf16, #tpu.memory_space<vmem>>, vector<8x1024xbf16>
    %c0_1 = arith.constant 0 : index
    %c0_2 = arith.constant 0 : index
    %1 = vector.load %arg2[%c0_1, %c0_2] : memref<1024x128xbf16, #tpu.memory_space<vmem>>, vector<1024x128xbf16>
    %cst = arith.constant dense<0.000000e+00> : vector<8x128xf32>
    %2 = tpu.matmul %0, %1, %cst {dimension_numbers = #tpu.dot_dimension_numbers<[1], [0], [0], [1], [0, 0, 1, 1], [], []>} : vector<8x1024xbf16>, vector<1024x128xbf16>, vector<8x128xf32> -> vector<8x128xf32>
    %c0_3 = arith.constant 0 : index
    %c0_4 = arith.constant 0 : index
    %3 = vector.load %arg3[%c0_3, %c0_4] : memref<1x128xf32, #tpu.memory_space<vmem>>, vector<1x128xf32>
    %4 = vector.broadcast %3 : vector<1x128xf32> to vector<8x128xf32>
    %5 = arith.addf %2, %4 : vector<8x128xf32>
    %c0_5 = arith.constant 0 : index
    %c0_6 = arith.constant 0 : index
    %6 = vector.load %arg5[%c0_5, %c0_6] : memref<8x128xf32, #tpu.memory_space<vmem>>, vector<8x128xf32>
    tpu.vector_store %arg5[%c0_5, %c0_6], %5 {strides = array<i32>} : memref<8x128xf32, #tpu.memory_space<vmem>>, vector<8x128xf32>,
    %c0_7 = arith.constant 0 : index
    %c0_8 = arith.constant 0 : index
    %7 = vector.load %arg4[%c0_7, %c0_8] : memref<8x128xf32, #tpu.memory_space<vmem>>, vector<8x128xf32>
    %cst_9 = arith.constant 0.000000e+00 : f32
    %8 = vector.broadcast %cst_9 : f32 to vector<8x128xf32>
    %9 = arith.maximumf %5, %8 : vector<8x128xf32>
    %10 = arith.mulf %5, %7 : vector<8x128xf32>
    %11 = arith.subf %9, %10 : vector<8x128xf32>
    %12 = math.absf %5 : vector<8x128xf32>
    %cst_10 = arith.constant 0.000000e+00 : f32
    %13 = vector.broadcast %cst_10 : f32 to vector<8x128xf32>
    %14 = arith.subf %13, %12 : vector<8x128xf32>
    %15 = math.exp %14 : vector<8x128xf32>
    %16 = math.log1p %15 : vector<8x128xf32>
    %17 = arith.addf %11, %16 : vector<8x128xf32>
    %18 = tpu.iota {dimensions = array<i32: 0>} : vector<8x128xi32>
    %c8_i32 = arith.constant 8 : i32
    %19 = arith.muli %arg0, %c8_i32 : i32
    %20 = vector.broadcast %19 : i32 to vector<8x128xi32>
    %21 = arith.addi %18, %20 : vector<8x128xi32>
    %22 = tpu.iota {dimensions = array<i32: 1>} : vector<8x128xi32>
    %c2_i32 = arith.constant 2 : i32
    %23 = vector.broadcast %c2_i32 : i32 to vector<8x128xi32>
    %24 = arith.cmpi slt, %21, %23 : vector<8x128xi32>
    %c4_i32 = arith.constant 4 : i32
    %25 = vector.broadcast %c4_i32 : i32 to vector<8x128xi32>
    %26 = arith.cmpi slt, %22, %25 : vector<8x128xi32>
    %27 = arith.andi %24, %26 : vector<8x128xi1>
    %cst_11 = arith.constant 0.000000e+00 : f32
    %28 = vector.broadcast %cst_11 : f32 to vector<8x128xf32>
    %29 = arith.select %27, %17, %28 : vector<8x128xi1>, vector<8x128xf32>
    %c0_12 = arith.constant 0 : index
    %c0_13 = arith.constant 0 : index
    %30 = vector.load %arg6[%c0_12, %c0_13] : memref<8x128xf32, #tpu.memory_space<vmem>>, vector<8x128xf32>
    tpu.vector_store %arg6[%c0_12, %c0_13], %29 {strides = array<i32>} : memref<8x128xf32, #tpu.memory_space<vmem>>, vector<8x128xf32>,
    return
  }
  func.func @transform_0(%arg0: i32) -> (i32, i32) {
    %c0_i32 = arith.constant 0 : i32
    %c0_i32_0 = arith.constant 0 : i32
    return %arg0, %c0_i32 : i32, i32
  }
  func.func @transform_1(%arg0: i32) -> (i32, i32) {
    %c0_i32 = arith.constant 0 : i32
    %c0_i32_0 = arith.constant 0 : i32
    %c0_i32_1 = arith.constant 0 : i32
    return %c0_i32, %c0_i32_0 : i32, i32
  }
  func.func @transform_2(%arg0: i32) -> (i32, i32) {
    %c0_i32 = arith.constant 0 : i32
    %c0_i32_0 = arith.constant 0 : i32
    %c0_i32_1 = arith.constant 0 : i32
    return %c0_i32, %c0_i32_0 : i32, i32
  }
  func.func @transform_3(%arg0: i32) -> (i32, i32) {
    %c0_i32 = arith.constant 0 : i32
    %c0_i32_0 = arith.constant 0 : i32
    return %arg0, %c0_i32 : i32, i32
  }
  func.func @transform_4(%arg0: i32) -> (i32, i32) {
    %c0_i32 = arith.constant 0 : i32
    %c0_i32_0 = arith.constant 0 : i32
    return %arg0, %c0_i32 : i32, i32
  }
  func.func @transform_5(%arg0: i32) -> (i32, i32) {
    %c0_i32 = arith.constant 0 : i32
    %c0_i32_0 = arith.constant 0 : i32
    return %arg0, %c0_i32 : i32, i32
  }
}

</mosaic_0001>

<bundles_post_ra>
// kernel: swav_forward.1
= control target key start
LH: loop header
LB: loop body
LE: loop exit
PB: predicated region body
PF: predicated region fallthrough
CT: control target
= control target key end

     0   :  { %11 = vsyncpa [#allocation3], 0  ;;  %s1049_s18 = smov [#allocation2]   ;;  %s1118_s0 = inlined_call_operand.vmem [shape: bf16[8,1024], index: 0, kind: input, shape index: {}]   ;;  %s1119_s1 = inlined_call_operand.hbm [shape: bf16[1024,128], index: 1, kind: input, shape index: {}]   ;;  %s1120_s2 = inlined_call_operand.vmem [shape: f32[1,128], index: 2, kind: input, shape index: {}]   ;;  %s1121_s3 = inlined_call_operand.vmem [shape: f32[8,128], index: 3, kind: input, shape index: {}]   ;;  %s1122_s4 = inlined_call_operand.vmem [shape: f32[8,128], index: 4, kind: output, shape index: {0}]   ;;  %s1123_s5 = inlined_call_operand.vmem [shape: f32[8,128], index: 5, kind: output, shape index: {1}]  }
   0x1   :  { %s19_s19 = sshll.u32 %s1049_s18, 4  ;;  %s1025_s22 = scalar_lea.hbm %s1119_s1, 8192  ;;  %s20_s19 = int_to_ptr.vmem [resolvable:$true] %s19_s19 }
   0x2   :  { %p1026_p0 = scmp.ne.s32.totalorder %s1119_s1, %s1025_s22  ;;  %p1029_p1 = scmp.lt.u32.totalorder %s1025_s22, %s1119_s1 }
   0x4   :  { %p1031_p2 = pnand %p1029_p1, %p1026_p0 }
   0x6   :  { %1034 = shalt.err (!%p1031_p2)
}
   0x7   :  { %s1035_s27 = scalar_lea.vmem %s20_s19, 8192  ;;  %p1040_p4 = scmp.lt.s32.totalorder %s20_s19, %s20_s19 }
   0x8   :  { %p1036_p3 = scmp.ne.s32.totalorder %s20_s19, %s1035_s27  ;;  %p1041_p5 = scmp.lt.s32.totalorder %s1035_s27, %s1035_s27 }
   0xa   :  { %p1042_p6 = por %p1041_p5, %p1040_p4 }
   0xc   :  { %p1043_p7 = pnand %p1042_p6, %p1036_p3 }
   0xe   :  { %1046 = shalt.err (!%p1043_p7)
}
   0xf   :  { %s1050_s28 = smov 64   ;;  %s1051_s29 = smov 4  }
  0x10   :  { %25 = dma.hbm_to_vmem [thread:$0]  %s1119_s1, 8192, %s20_s19, [#allocation3], %s1050_s28, %s1050_s28, %s1051_s29  }
  0x11   :  { %1047 = dma.done.wait [#allocation3], 8192  }
  0x12   :  { %1048 = vsyncadd [#allocation3], 4294959104  ;;  %v949_v0 = vld [vmem:[#allocation2 + $0x40] sm:$0xff]   ;;  %v953_v4 = vld [vmem:[#allocation2 + $0x48] sm:$0xff]  }
  0x13   :  { %v950_v1 = vld [vmem:[#allocation2 + $0xc0] sm:$0xff]   ;;  %858 = vmatprep.subr.bf16.mxu0 %v949_v0  ;;  %v954_v5 = vld [vmem:[#allocation2 + $0xc8] sm:$0xff]   ;;  %v957_v8 = vld [vmem:[#allocation2 + $0x50] sm:$0xff]  }
  0x14   :  { %v951_v2 = vld [vmem:[#allocation2] sm:$0xff]   ;;  %880 = vmatprep.subr.bf16.mxu1 %v950_v1  ;;  %v955_v6 = vld [vmem:[#allocation2 + $0x8] sm:$0xff]   ;;  %v958_v9 = vld [vmem:[#allocation2 + $0xd0] sm:$0xff]  }
  0x15   :  { %v952_v3 = vld [vmem:[#allocation2 + $0x80] sm:$0xff]   ;;  %859 = vmatpush3.bf16.msra.mxu0 %v951_v2  ;;  %v956_v7 = vld [vmem:[#allocation2 + $0x88] sm:$0xff]   ;;  %v959_v10 = vld [vmem:[#allocation2 + $0x10] sm:$0xff]  }
  0x16   :  { %881 = vmatpush3.bf16.msra.mxu1 %v952_v3  ;;  %860 = vmatprep.subr.bf16.mxu0 %v953_v4  ;;  %v960_v11 = vld [vmem:[#allocation2 + $0x90] sm:$0xff]   ;;  %v961_v12 = vld [vmem:[#allocation2 + $0x58] sm:$0xff]   ;;  %v965_v16 = vld [vmem:[#allocation2 + $0x60] sm:$0xff]  }
  0x17   :  { %882 = vmatprep.subr.bf16.mxu1 %v954_v5  ;;  %v962_v13 = vld [vmem:[#allocation2 + $0xd8] sm:$0xff]   ;;  %v966_v17 = vld [vmem:[#allocation2 + $0xe0] sm:$0xff]   ;;  %v969_v20 = vld [vmem:[#allocation2 + $0x68] sm:$0xff]  }
  0x18   :  { %v963_v14 = vld [vmem:[#allocation2 + $0x18] sm:$0xff]   ;;  %v967_v18 = vld [vmem:[#allocation2 + $0x20] sm:$0xff]   ;;  %v970_v21 = vld [vmem:[#allocation2 + $0xe8] sm:$0xff]  }
  0x19   :  { %861 = vmatpush3.bf16.msra.mxu0 %v955_v6  ;;  %v964_v15 = vld [vmem:[#allocation2 + $0x98] sm:$0xff]   ;;  %v968_v19 = vld [vmem:[#allocation2 + $0xa0] sm:$0xff]   ;;  %v971_v22 = vld [vmem:[#allocation2 + $0x28] sm:$0xff]  }
  0x1a   :  { %883 = vmatpush3.bf16.msra.mxu1 %v956_v7  ;;  %862 = vmatprep.subr.bf16.mxu0 %v957_v8  ;;  %v972_v23 = vld [vmem:[#allocation2 + $0xa8] sm:$0xff]   ;;  %v973_v24 = vld [vmem:[#allocation2 + $0x70] sm:$0xff]   ;;  %v977_v28 = vld [vmem:[#allocation2 + $0x78] sm:$0xff]  }
  0x1b   :  { %884 = vmatprep.subr.bf16.mxu1 %v958_v9  ;;  %v974_v25 = vld [vmem:[#allocation2 + $0xf0] sm:$0xff]   ;;  %v978_v29 = vld [vmem:[#allocation2 + $0xf8] sm:$0xff]   ;;  %v34_v32 = vld [vmem:[%s1118_s0] sm:$0xff] }
  0x1c   :  { %v975_v26 = vld [vmem:[#allocation2 + $0x30] sm:$0xff]   ;;  %v979_v30 = vld [vmem:[#allocation2 + $0x38] sm:$0xff]   ;;  %v35_v33 = vld [vmem:[%s1118_s0 + $0x8] sm:$0xff]  ;;  %v786_v34 = vcombine.low %v34_v32, %v34_v32  ;;  %v787_v35 = vcombine.high %v34_v32, %v34_v32 }
  0x1d   :  { %863 = vmatpush3.bf16.msra.mxu0 %v959_v10  ;;  %v976_v27 = vld [vmem:[#allocation2 + $0xb0] sm:$0xff]   ;;  %v980_v31 = vld [vmem:[#allocation2 + $0xb8] sm:$0xff]   ;;  %v788_v36 = vcombine.low %v35_v33, %v35_v33  ;;  %v789_v37 = vcombine.high %v35_v33, %v35_v33  ;;  %v985_v38 = vld [vmem:[#allocation2 + $0x140] sm:$0xff]  }
  0x1e   :  { %885 = vmatpush3.bf16.msra.mxu1 %v960_v11  ;;  %864 = vmatprep.subr.bf16.mxu0 %v961_v12  ;;  %v986_v39 = vld [vmem:[#allocation2 + $0x1c0] sm:$0xff]   ;;  %v989_v42 = vld [vmem:[#allocation2 + $0x148] sm:$0xff]   ;;  %v993_v46 = vld [vmem:[#allocation2 + $0x150] sm:$0xff]  }
  0x1f   :  { %886 = vmatprep.subr.bf16.mxu1 %v962_v13  ;;  %617 = vmatprep.mubr.bf16.mxu0 %v787_v35  ;;  %v987_v40 = vld [vmem:[#allocation2 + $0x100] sm:$0xff]   ;;  %v990_v43 = vld [vmem:[#allocation2 + $0x1c8] sm:$0xff]   ;;  %v994_v47 = vld [vmem:[#allocation2 + $0x1d0] sm:$0xff]  }
  0x20   :  { %657 = vmatprep.mubr.bf16.mxu1 %v789_v37  ;;  %v988_v41 = vld [vmem:[#allocation2 + $0x180] sm:$0xff]   ;;  %v991_v44 = vld [vmem:[#allocation2 + $0x108] sm:$0xff]   ;;  %v995_v48 = vld [vmem:[#allocation2 + $0x110] sm:$0xff]  }
  0x21   :  { %865 = vmatpush3.bf16.msra.mxu0 %v963_v14  ;;  %v992_v45 = vld [vmem:[#allocation2 + $0x188] sm:$0xff]   ;;  %v996_v49 = vld [vmem:[#allocation2 + $0x190] sm:$0xff]   ;;  %v997_v50 = vld [vmem:[#allocation2 + $0x158] sm:$0xff]  }
  0x22   :  { %887 = vmatpush3.bf16.msra.mxu1 %v964_v15  ;;  %866 = vmatprep.subr.bf16.mxu0 %v965_v16  ;;  %v998_v51 = vld [vmem:[#allocation2 + $0x1d8] sm:$0xff]   ;;  %v1001_v54 = vld [vmem:[#allocation2 + $0x160] sm:$0xff]   ;;  %v1005_v58 = vld [vmem:[#allocation2 + $0x168] sm:$0xff]  }
  0x23   :  { %888 = vmatprep.subr.bf16.mxu1 %v966_v17  ;;  %v999_v52 = vld [vmem:[#allocation2 + $0x118] sm:$0xff]   ;;  %v1002_v55 = vld [vmem:[#allocation2 + $0x1e0] sm:$0xff]   ;;  %v1006_v59 = vld [vmem:[#allocation2 + $0x1e8] sm:$0xff]  }
  0x24   :  { %v1000_v53 = vld [vmem:[#allocation2 + $0x198] sm:$0xff]   ;;  %v1003_v56 = vld [vmem:[#allocation2 + $0x120] sm:$0xff]   ;;  %v1007_v60 = vld [vmem:[#allocation2 + $0x128] sm:$0xff]  }
  0x25   :  { %867 = vmatpush3.bf16.msra.mxu0 %v967_v18  ;;  %v1004_v57 = vld [vmem:[#allocation2 + $0x1a0] sm:$0xff]   ;;  %v1008_v61 = vld [vmem:[#allocation2 + $0x1a8] sm:$0xff]   ;;  %v1009_v62 = vld [vmem:[#allocation2 + $0x170] sm:$0xff]  }
  0x26   :  { %889 = vmatpush3.bf16.msra.mxu1 %v968_v19  ;;  %868 = vmatprep.subr.bf16.mxu0 %v969_v20  ;;  %v1010_v63 = vld [vmem:[#allocation2 + $0x1f0] sm:$0xff]   ;;  %v1013_v2 = vld [vmem:[#allocation2 + $0x178] sm:$0xff]   ;;  %v785_v14 = vld [vmem:[%s1120_s2] ss:$0 sm:$0xff] }
  0x27   :  { %890 = vmatprep.subr.bf16.mxu1 %v970_v21  ;;  %v1011_v0 = vld [vmem:[#allocation2 + $0x130] sm:$0xff]   ;;  %v1014_v3 = vld [vmem:[#allocation2 + $0x1f8] sm:$0xff]  }
  0x28   :  { %v1012_v1 = vld [vmem:[#allocation2 + $0x1b0] sm:$0xff]   ;;  %v1015_v4 = vld [vmem:[#allocation2 + $0x138] sm:$0xff]  }
  0x29   :  { %869 = vmatpush3.bf16.msra.mxu0 %v971_v22  ;;  %v1016_v5 = vld [vmem:[#allocation2 + $0x1b8] sm:$0xff]   ;;  %v36_v6 = vld [vmem:[%s1118_s0 + $0x10] sm:$0xff] }
  0x2a   :  { %891 = vmatpush3.bf16.msra.mxu1 %v972_v23  ;;  %870 = vmatprep.subr.bf16.mxu0 %v973_v24  ;;  %v790_v7 = vcombine.low %v36_v6, %v36_v6  ;;  %v791_v8 = vcombine.high %v36_v6, %v36_v6  ;;  %v37_v9 = vld [vmem:[%s1118_s0 + $0x18] sm:$0xff] }
  0x2b   :  { %892 = vmatprep.subr.bf16.mxu1 %v974_v25  ;;  %v792_v10 = vcombine.low %v37_v9, %v37_v9  ;;  %v793_v11 = vcombine.high %v37_v9, %v37_v9 }
  0x2d   :  { %871 = vmatpush3.bf16.msra.mxu0 %v975_v26 }
  0x2e   :  { %893 = vmatpush3.bf16.msra.mxu1 %v976_v27  ;;  %872 = vmatprep.subr.bf16.mxu0 %v977_v28 }
  0x2f   :  { %894 = vmatprep.subr.bf16.mxu1 %v978_v29 }
  0x31   :  { %873 = vmatpush3.bf16.msra.mxu0 %v979_v30 }
  0x32   :  { %895 = vmatpush3.bf16.msra.mxu1 %v980_v31  ;;  %902 = vmatprep.subr.bf16.mxu0 %v985_v38 }
  0x33   :  { %924 = vmatprep.subr.bf16.mxu1 %v986_v39 }
  0x34   :  { %618 = vmatmul.mubr.bf16.vlgmr.msra.gmra.mrb[0].mxu0 %v786_v34 }
  0x35   :  { %658 = vmatmul.mubr.bf16.vlgmr.msra.gmra.mrb[0].mxu1 %v788_v36  ;;  %903 = vmatpush3.bf16.msra.mxu0 %v987_v40 }
  0x36   :  { %925 = vmatpush3.bf16.msra.mxu1 %v988_v41  ;;  %904 = vmatprep.subr.bf16.mxu0 %v989_v42  ;;  %v764_v42 = vlaneseq }
  0x37   :  { %926 = vmatprep.subr.bf16.mxu1 %v990_v43  ;;  %697 = vmatprep.mubr.bf16.mxu0 %v791_v8 }
  0x38   :  { %737 = vmatprep.mubr.bf16.mxu1 %v793_v11 }
  0x39   :  { %905 = vmatpush3.bf16.msra.mxu0 %v991_v44  ;;  %v746_v44 = vld [vmem:[%s1121_s3] sm:$0xff] }
  0x3a   :  { %927 = vmatpush3.bf16.msra.mxu1 %v992_v45  ;;  %906 = vmatprep.subr.bf16.mxu0 %v993_v46  ;;  %v765_v45 = vshrl.u32 %v764_v42, 7  ;;  %v770_v46 = vand.u32 127, %v764_v42 }
  0x3b   :  { %928 = vmatprep.subr.bf16.mxu1 %v994_v47 }
  0x3c   :  { %vm771_vm0 = vcmp.lt.s32.totalorder %v765_v45, 2  ;;  %vm772_vm1 = vcmp.lt.s32.totalorder %v770_v46, 4 }
  0x3d   :  { %907 = vmatpush3.bf16.msra.mxu0 %v995_v48  ;;  %vm773_vm3 = vmand %vm771_vm0, %vm772_vm1 }
  0x3e   :  { %929 = vmatpush3.bf16.msra.mxu1 %v996_v49  ;;  %908 = vmatprep.subr.bf16.mxu0 %v997_v50 }
  0x3f   :  { %930 = vmatprep.subr.bf16.mxu1 %v998_v51 }
  0x41   :  { %909 = vmatpush3.bf16.msra.mxu0 %v999_v52 }
  0x42   :  { %931 = vmatpush3.bf16.msra.mxu1 %v1000_v53  ;;  %910 = vmatprep.subr.bf16.mxu0 %v1001_v54 }
  0x43   :  { %932 = vmatprep.subr.bf16.mxu1 %v1002_v55 }
  0x45   :  { %911 = vmatpush3.bf16.msra.mxu0 %v1003_v56 }
  0x46   :  { %933 = vmatpush3.bf16.msra.mxu1 %v1004_v57  ;;  %912 = vmatprep.subr.bf16.mxu0 %v1005_v58 }
  0x47   :  { %934 = vmatprep.subr.bf16.mxu1 %v1006_v59 }
  0x49   :  { %913 = vmatpush3.bf16.msra.mxu0 %v1007_v60 }
  0x4a   :  { %935 = vmatpush3.bf16.msra.mxu1 %v1008_v61  ;;  %914 = vmatprep.subr.bf16.mxu0 %v1009_v62 }
  0x4b   :  { %936 = vmatprep.subr.bf16.mxu1 %v1010_v63 }
  0x4d   :  { %915 = vmatpush3.bf16.msra.mxu0 %v1011_v0 }
  0x4e   :  { %937 = vmatpush3.bf16.msra.mxu1 %v1012_v1  ;;  %916 = vmatprep.subr.bf16.mxu0 %v1013_v2 }
  0x4f   :  { %938 = vmatprep.subr.bf16.mxu1 %v1014_v3 }
  0x51   :  { %917 = vmatpush3.bf16.msra.mxu0 %v1015_v4 }
  0x52   :  { %939 = vmatpush3.bf16.msra.mxu1 %v1016_v5 }
  0x54   :  { %698 = vmatmul.mubr.bf16.vlgmr.msra.gmra.mrb[4].mxu0 %v790_v7 }
  0x55   :  { %738 = vmatmul.mubr.bf16.vlgmr.msra.gmra.mrb[4].mxu1 %v792_v10 }
 0x107   :  { %v874_v12 = vpop.f32.mrb[0].mxu0 }
 0x108   :  { %v896_v13 = vpop.f32.mrb[0].mxu1  ;;  %v875_v15 = vpop.f32.mrb[1].mxu0 }
 0x109   :  { %v897_v16 = vpop.f32.mrb[1].mxu1  ;;  %v876_v17 = vadd.f32 %v875_v15, %v874_v12  ;;  %v877_v19 = vpop.f32.mrb[2].mxu0 }
 0x10a   :  { %v898_v18 = vadd.f32 %v897_v16, %v896_v13  ;;  %v899_v20 = vpop.f32.mrb[2].mxu1  ;;  %v878_v21 = vpop.f32.mrb[3].mxu0 }
 0x10b   :  { %v900_v22 = vpop.f32.mrb[3].mxu1  ;;  %v620_v23 = vadd.f32 %v876_v17, %v785_v14 }
 0x10d   :  { %v660_v24 = vadd.f32 %v898_v18, %v620_v23 }
 0x127   :  { %v918_v25 = vpop.f32.mrb[4].mxu0 }
 0x128   :  { %v940_v26 = vpop.f32.mrb[4].mxu1  ;;  %v919_v27 = vpop.f32.mrb[5].mxu0 }
 0x129   :  { %v941_v28 = vpop.f32.mrb[5].mxu1  ;;  %v920_v29 = vadd.f32 %v919_v27, %v918_v25  ;;  %v921_v31 = vpop.f32.mrb[6].mxu0 }
 0x12a   :  { %v942_v30 = vadd.f32 %v941_v28, %v940_v26  ;;  %v943_v32 = vpop.f32.mrb[6].mxu1  ;;  %v922_v33 = vpop.f32.mrb[7].mxu0 }
 0x12b   :  { %v944_v34 = vpop.f32.mrb[7].mxu1  ;;  %v700_v35 = vadd.f32 %v920_v29, %v660_v24 }
 0x12d   :  { %v740_v36 = vadd.f32 %v942_v30, %v700_v35 }
 0x12f   :  { %745 = vst [vmem:[%s1122_s4] sm:$0xff] %v740_v36  ;;  %v750_v37 = vand.u32 2147483647, %v740_v36  ;;  %v747_v48 = vmax.f32 %v740_v36, 0.0  ;;  %v748_v49 = vmul.f32 %v746_v44, %v740_v36 }
 0x131   :  { %v751_v38 = vsub.f32 0.0, %v750_v37  ;;  %v749_v54 = vsub.f32 %v747_v48, %v748_v49 }
 0x133   :  { %v752_v39 = vmul.f32 1.442695, %v751_v38 }
 0x135   :  { %1021 = vpow2.f32 %v752_v39 }
 0x13f   :  { %v1022_v40 = vpop.eup %1021 }
 0x140   :  { %v754_v41 = vadd.f32 1.0, %v1022_v40  ;;  %v757_v43 = vmul.f32 -0.5, %v1022_v40  ;;  %v760_v50 = vand.u32 2147483647, %v1022_v40 }
 0x142   :  { %1023 = vlog2.f32 %v754_v41  ;;  %v758_v47 = vadd.f32 1.0, %v757_v43  ;;  %vm761_vm2 = vcmp.lt.f32.partialorder %v760_v50, 0.0004427343 }
 0x144   :  { %v759_v53 = vmul.f32 %v1022_v40, %v758_v47 }
 0x14c   :  { %v1024_v51 = vpop.eup %1023 }
 0x14d   :  { %v756_v52 = vmul.f32 0.6931472, %v1024_v51 }
 0x14f   :  { %v762_v55 = vsel %vm761_vm2, %v759_v53, %v756_v52 }
 0x150   :  { %v763_v56 = vadd.f32 %v762_v55, %v749_v54 }
 0x152   :  { %v774_v57 = vsel %vm773_vm3, %v763_v56, 0.0 }
 0x153   :  { %775 = vst [vmem:[%s1123_s5] sm:$0xff] %v774_v57 }
 0x154   :  { %784 = vsyncpa [#allocation3], 1 }

</bundles_post_ra>
